<compile_context>
chip_gen: v5e
topology: v5e:2x2
jax: 0.10.0
libtpu: 0.0.40
codegen_flags: <defaults>
</compile_context>

<pallas_src>
import jax
import jax.numpy as jnp
import numpy as np
from jax import lax
from jax.experimental import pallas as pl
from jax.experimental.pallas import tpu as pltpu

_LANES = 128
_SUBLANES = 8


def _round_up(x, m):
    return ((x + m - 1) // m) * m


def time_encode_kernel(ts_ref, m_ref, out_ref):
    # ts_ref:  (K, TILE_R) f32 -- rows 0..pack-1: packed timestamps,
    #                             row pack: ones (carries phase), rest: zeros.
    # m_ref:   (K, W)      f32 -- rows 0..pack-1: 0/1 selector * lane-tiled
    #                             freq, row pack: lane-tiled phase, rest: zeros.
    # out_ref: (TILE_R, W)     -- lane-dense packed output.
    #
    # out[r, l] = cos( sum_k ts_ref[k, r] * m_ref[k, l] )
    #           = cos( ts_packed[r, l // D] * freq[l % D] + phase[l % D] )
    mapped = lax.dot_general(
        ts_ref[...], m_ref[...],
        dimension_numbers=(((0,), (0,)), ((), ())),
        preferred_element_type=jnp.float32,
        precision=lax.Precision.HIGHEST,   # keep f32 mantissa through the MXU
    )
    out_ref[...] = jnp.cos(mapped).astype(out_ref.dtype)


def _choose_tile_r(R, tile_rows):
    """Packed-row tile: multiple of 128 when the grid has >1 step; >=2 steps
    for moderate R so both v7x TensorCores engage."""
    if R < 512 and R <= tile_rows:
        return R                                   # single resident block
    target = min(int(tile_rows), -(-R // 2))       # force >= 2 grid steps
    return max(_LANES, _round_up(target, _LANES))


def time_encode(ts, basis_freq, phase, *, tile_rows=2048, out_dtype=jnp.float32):
    """ts: (B,) float; basis_freq, phase: (D,) float -> (B, D) out_dtype."""
    B = int(ts.shape[0])
    D = int(basis_freq.shape[0])

    # Lane packing: `pack` logical rows of width d_pad fill one 128-lane row.
    if D < _LANES and _LANES % D == 0:
        pack, d_pad = _LANES // D, D
    elif D % _LANES == 0:
        pack, d_pad = 1, D
    else:
        pack, d_pad = 1, _round_up(D, _LANES)      # junk lanes, sliced off below
    W = pack * d_pad
    K = _round_up(pack + 1, _SUBLANES)             # MXU contraction depth

    # Packed timestamps, transposed to (pack, R): lane-dense, contiguous DMA.
    R = -(-B // pack)
    B_ceil = R * pack
    ts_f32 = ts.astype(jnp.float32)
    if B_ceil != B:
        ts_f32 = jnp.pad(ts_f32, (0, B_ceil - B))  # at most pack-1 elements
    ts_rows = ts_f32.reshape(R, pack).T            # (pack, R)
    ts_aug = jnp.concatenate(
        [ts_rows,
         jnp.ones((1, R), jnp.float32),            # carries the phase term
         jnp.zeros((K - pack - 1, R), jnp.float32)], axis=0)       # (K, R)

    # Folded map matrix M.
    freq_p = basis_freq.astype(jnp.float32)
    phase_p = phase.astype(jnp.float32)
    if d_pad != D:
        freq_p = jnp.pad(freq_p, (0, d_pad - D))
        phase_p = jnp.pad(phase_p, (0, d_pad - D))
    freq_t = jnp.tile(freq_p, pack)                # (W,): freq[l % d_pad]
    phase_t = jnp.tile(phase_p, pack)              # (W,)
    sel = jnp.asarray(
        (np.arange(W)[None, :] // d_pad == np.arange(pack)[:, None])
        .astype(np.float32))                       # (pack, W) 0/1 selector
    m_mat = jnp.concatenate(
        [sel * freq_t[None, :],
         phase_t[None, :],
         jnp.zeros((K - pack - 1, W), jnp.float32)], axis=0)       # (K, W)

    tile_r = _choose_tile_r(R, tile_rows)
    grid = (pl.cdiv(R, tile_r),)                   # ragged last block is masked

    out_bytes = np.dtype(out_dtype).itemsize
    cost = pl.CostEstimate(
        flops=2 * R * K * W,
        transcendentals=R * W,
        bytes_accessed=K * R * 4 + K * W * 4 + R * W * out_bytes,
    )

    out_packed = pl.pallas_call(
        time_encode_kernel,
        out_shape=jax.ShapeDtypeStruct((R, W), out_dtype),
        grid=grid,
        in_specs=[
            pl.BlockSpec((K, tile_r), lambda i: (0, i)),   # ts, tiled over rows
            pl.BlockSpec((K, W), lambda i: (0, 0)),        # folded map, resident
        ],
        out_specs=pl.BlockSpec((tile_r, W), lambda i: (i, 0)),
        compiler_params=pltpu.CompilerParams(
            dimension_semantics=("parallel",),             # megacore split (v7x)
        ),
        cost_estimate=cost,
    )(ts_aug, m_mat)

    # (R, W) row-major is byte-identical to (B_ceil, d_pad): free reshape.
    out = out_packed.reshape(B_ceil, d_pad)
    if d_pad != D:
        out = out[:, :D]        # only when D doesn't divide / isn't a multiple of 128
    if B_ceil != B:
        out = out[:B]           # no-op whenever B is pack-aligned
    return out


def make_time_encode_params(expand_dim):
    """Deterministic parameter init, matching the PyTorch __init__."""
    basis_freq = (1.0 / 10.0 ** np.linspace(0, 9, expand_dim)).astype(np.float32)
    phase = np.zeros(expand_dim, dtype=np.float32)
    return jnp.asarray(basis_freq), jnp.asarray(phase)


def _reference(ts, basis_freq, phase):
    return jnp.cos(ts[:, None].astype(jnp.float32) * basis_freq[None, :]
                   + phase[None, :])


if __name__ == "__main__":
    key = jax.random.PRNGKey(0)
    k1, k2, k3 = jax.random.split(key, 3)

    # Small shape consistent with the module forward (batch of timestamps).
    TIME_DIM = 32
    basis_freq, phase = make_time_encode_params(TIME_DIM)
    B_small = 8
    ts_small = jax.random.uniform(k1, (B_small,), dtype=jnp.float32,
                                  minval=0.0, maxval=100.0)
    out_small = jax.block_until_ready(time_encode(ts_small, basis_freq, phase))
    assert out_small.shape == (B_small, TIME_DIM)
    np.testing.assert_allclose(np.asarray(out_small),
                               np.asarray(_reference(ts_small, basis_freq, phase)),
                               rtol=5e-5, atol=5e-5)

    # Misaligned batch: multi-step grid with a ragged (masked) last block.
    B_big = 1030
    ts_big = jax.random.uniform(k2, (B_big,), dtype=jnp.float32,
                                minval=0.0, maxval=100.0)
    out_big = jax.block_until_ready(
        time_encode(ts_big, basis_freq, phase, tile_rows=128))
    assert out_big.shape == (B_big, TIME_DIM)
    np.testing.assert_allclose(np.asarray(out_big),
                               np.asarray(_reference(ts_big, basis_freq, phase)),
                               rtol=5e-5, atol=5e-5)

    # time_dim that does not divide 128 (e.g. TGAT's common 100): padded lanes.
    TIME_DIM2 = 100
    bf2, ph2 = make_time_encode_params(TIME_DIM2)
    B3 = 16
    ts3 = jax.random.uniform(k3, (B3,), dtype=jnp.float32,
                             minval=0.0, maxval=100.0)
    out3 = jax.block_until_ready(time_encode(ts3, bf2, ph2))
    assert out3.shape == (B3, TIME_DIM2)
    np.testing.assert_allclose(np.asarray(out3),
                               np.asarray(_reference(ts3, bf2, ph2)),
                               rtol=5e-5, atol=5e-5)

    print("KERNEL_OK")
</pallas_src>

<mosaic_0001>
module attributes {stable_mosaic.version = 11 : i64} {
  func.func @time_encode_kernel(%arg0: i32, %arg1: memref<8x2xf32, #tpu.memory_space<vmem>>, %arg2: memref<8x128xf32, #tpu.memory_space<vmem>>, %arg3: memref<2x128xf32, #tpu.memory_space<vmem>>) attributes {dimension_semantics = [#tpu.dimension_semantics<parallel>], iteration_bounds = array<i64: 1>, scalar_prefetch = 0 : i64, scratch_operands = 0 : i64, tpu.core_type = #tpu.core_type<tc>, window_params = [{transform_indices = @transform_0, window_bounds = array<i64: 8, 2>}, {pipeline_mode = #tpu.pipeline_mode<synchronous>, transform_indices = @transform_1, window_bounds = array<i64: 8, 128>}, {transform_indices = @transform_2, window_bounds = array<i64: 2, 128>}]} {
    %c0 = arith.constant 0 : index
    %c0_0 = arith.constant 0 : index
    %0 = vector.load %arg1[%c0, %c0_0] : memref<8x2xf32, #tpu.memory_space<vmem>>, vector<8x2xf32>
    %c0_1 = arith.constant 0 : index
    %c0_2 = arith.constant 0 : index
    %1 = vector.load %arg2[%c0_1, %c0_2] : memref<8x128xf32, #tpu.memory_space<vmem>>, vector<8x128xf32>
    %cst = arith.constant dense<0.000000e+00> : vector<2x128xf32>
    %2 = tpu.matmul %0, %1, %cst {dimension_numbers = #tpu.dot_dimension_numbers<[0], [0], [1], [1], [0, 1, 1, 1], [], []>, precision = #tpu.contract_precision<fp32>} : vector<8x2xf32>, vector<8x128xf32>, vector<2x128xf32> -> vector<2x128xf32>
    %3 = math.cos %2 : vector<2x128xf32>
    %c0_3 = arith.constant 0 : index
    %c0_4 = arith.constant 0 : index
    %4 = vector.load %arg3[%c0_3, %c0_4] : memref<2x128xf32, #tpu.memory_space<vmem>>, vector<2x128xf32>
    tpu.vector_store %arg3[%c0_3, %c0_4], %3 {strides = array<i32>} : memref<2x128xf32, #tpu.memory_space<vmem>>, vector<2x128xf32>,
    return
  }
  func.func @transform_0(%arg0: i32) -> (i32, i32) {
    %c0_i32 = arith.constant 0 : i32
    %c0_i32_0 = arith.constant 0 : i32
    return %c0_i32, %arg0 : i32, i32
  }
  func.func @transform_1(%arg0: i32) -> (i32, i32) {
    %c0_i32 = arith.constant 0 : i32
    %c0_i32_0 = arith.constant 0 : i32
    %c0_i32_1 = arith.constant 0 : i32
    return %c0_i32, %c0_i32_0 : i32, i32
  }
  func.func @transform_2(%arg0: i32) -> (i32, i32) {
    %c0_i32 = arith.constant 0 : i32
    %c0_i32_0 = arith.constant 0 : i32
    return %arg0, %c0_i32 : i32, i32
  }
}

</mosaic_0001>

<bundles_post_ra>
// kernel: tpu_custom_call.1
= control target key start
LH: loop header
LB: loop body
LE: loop exit
PB: predicated region body
PF: predicated region fallthrough
CT: control target
= control target key end

     0   :  { %s499_s0 = inlined_call_operand.vmem [shape: f32[8,2], index: 0, kind: input, shape index: {}]   ;;  %s500_s1 = inlined_call_operand.vmem [shape: f32[8,128], index: 1, kind: input, shape index: {}]   ;;  %s501_s2 = inlined_call_operand.hbm [shape: f32[2,128], index: 2, kind: output, shape index: {}]  }
   0x1   :  { %v12_v0 = vld [vmem:[%s499_s0] sm:$0xff] }
   0x2   :  { %7 = vsyncpa [#allocation3], 0  ;;  %14 = vxpose.xlu0.b32.start.end [1/1] (short) (narrow) %v12_v0, 8  ;;  %v13_v1 = vld [vmem:[%s500_s1] sm:$0xff]  ;;  %vm46_vm0 = vcmask 64512   ;;  %s412_s0 = smov [#allocation2]  }
   0x3   :  { %v65_v2 = vand.u32 4294901760, %v13_v1  ;;  %v405_v36 = vmov 2102212464   ;;  %v406_v38 = vmov 920167782   ;;  %s356_s1 = sshll.u32 %s412_s0, 4  ;;  %s357_s1 = int_to_ptr.vmem [resolvable:$true] %s356_s1 }
   0x4   :  { %v407_v41 = vmov 1326507024   ;;  %v408_v43 = vmov 683565275   ;;  %v409_v45 = vmov 2475754826  }
   0x5   :  { %v92_v3 = vsub.f32 %v13_v1, %v65_v2  ;;  %142 = vmatpush.msra.mxu3 %v65_v2  ;;  %66 = vmatpush.msra.mxu0 %v65_v2  ;;  %v410_v48 = vmov 2131351028   ;;  %s358_s15 = sshll.u32 %s501_s2, 4  ;;  %s359_s15 = int_to_ptr.hbm [resolvable:$true] %s358_s15 }
   0x7   :  { %v93_v4 = vand.u32 4294901760, %v92_v3  ;;  %119 = vmatpush.msra.mxu2 %v92_v3 }
   0x9   :  { %v94_v5 = vsub.f32 %v92_v3, %v93_v4  ;;  %168 = vmatpush.msrb.mxu0 %v93_v4 }
   0xb   :  { %v95_v6 = vand.u32 4294901760, %v94_v5 }
   0xd   :  { %96 = vmatpush.msra.mxu1 %v95_v6 }
   0xf   :  { %190 = vmatpush.msrb.mxu1 %v65_v2 }
  0xa6   :  { %v30_v7 = vpop.trf.xlu0 }
  0xa7   :  { %v48_v8 = vsel %vm46_vm0, %v30_v7, 0 }
  0xa8   :  { %v67_v9 = vand.u32 4294901760, %v48_v8 }
  0xaa   :  { %v68_v10 = vsub.f32 %v48_v8, %v67_v9  ;;  %98 = vmatmul.f32.vlgmr.msra.gmra.mxu1 %v67_v9 }
  0xac   :  { %122 = vmatmul.f32.vlgmr.msra.gmra.mxu2 %v68_v10  ;;  %v69_v11 = vand.u32 4294901760, %v68_v10 }
  0xae   :  { %146 = vmatmul.f32.vlgmr.msra.gmra.mxu3 %v69_v11  ;;  %v70_v12 = vsub.f32 %v68_v10, %v69_v11 }
  0xb0   :  { %v71_v13 = vand.u32 4294901760, %v70_v12 }
  0xb2   :  { %72 = vmatmul.f32.vlgmr.msra.gmra.mxu0 %v71_v13  ;;  %192 = vmatmul.f32.vlgmr.msrb.gmra.mxu1 %v67_v9 }
  0xba   :  { %170 = vmatmul.f32.vlgmr.msrb.gmra.mxu0 %v67_v9 }
 0x127   :  { %v99_v14 = vpop.f32.mrf.mxu1 }
 0x12f   :  { %v73_v15 = vpop.f32.mrf.mxu0  ;;  %v123_v17 = vpop.f32.mrf.mxu2 }
 0x130   :  { %v100_v16 = vadd.f32 %v99_v14, %v73_v15  ;;  %v193_v23 = vpop.f32.mrf.mxu1 }
 0x131   :  { %v147_v19 = vpop.f32.mrf.mxu3 }
 0x132   :  { %v124_v18 = vadd.f32 %v123_v17, %v100_v16 }
 0x134   :  { %v148_v20 = vadd.f32 %v147_v19, %v124_v18 }
 0x137   :  { %v171_v21 = vpop.f32.mrf.mxu0 }
 0x138   :  { %v172_v22 = vadd.f32 %v171_v21, %v148_v20 }
 0x13a   :  { %v434_v24 = vadd.f32 %v193_v23, %v172_v22  ;;  %v411_v22 = vmov 0  }
 0x13c   :  { %v199_v25 = vand.u32 2139095040, %v434_v24  ;;  %v196_v28 = vand.u32 2147483647, %v434_v24  ;;  %vm198_vm13 = vcmp.lt.s32.totalorder %v434_v24, 0 }
 0x13e   :  { %v200_v26 = vshrl.u32 %v199_v25, 23  ;;  %v203_v30 = vand.u32 8388607, %v196_v28  ;;  %vm486_vm14 = vcmp.le.f32.partialorder %v196_v28, 0.7853982 }
 0x140   :  { %v367_v27 = vadd.s32 4294967169, %v200_v26  ;;  %v204_v34 = vor.u32 8388608, %v203_v30 }
 0x142   :  { %v206_v29 = vadd.s32 1, %v367_v27  ;;  %v449_v55 = vshll.u32 %v204_v34, 8 }
 0x144   :  { %vm207_vm1 = vcmp.gt.s32.totalorder %v206_v29, 0  ;;  %v245_v1 = vand.u32 65535, %v449_v55  ;;  %v246_v3 = vshrl.u32 %v449_v55, 16 }
 0x145   :  { %v208_v31 = vsel %vm207_vm1, %v206_v29, 0 }
 0x146   :  { %v210_v32 = vand.u32 31, %v208_v31  ;;  %v442_v35 = vshrl.u32 %v208_v31, 5 }
 0x148   :  { %v440_v33 = vsub.s32 32, %v210_v32  ;;  %v222_v37 = vshll.u32 %v405_v36, %v210_v32  ;;  %v225_v39 = vshll.u32 %v406_v38, %v210_v32  ;;  %v213_v44 = vshll.u32 %v408_v43, %v210_v32 }
 0x149   :  { %v216_v47 = vshll.u32 %v409_v45, %v210_v32  ;;  %v219_v50 = vshll.u32 %v410_v48, %v210_v32  ;;  %vm231_vm2 = vcmp.lt.s32.totalorder %v442_v35, 4  ;;  %vm228_vm3 = vcmp.lt.s32.totalorder %v442_v35, 1 }
 0x14a   :  { %v223_v40 = vshrl.u32 %v406_v38, %v440_v33  ;;  %v226_v42 = vshrl.u32 %v407_v41, %v440_v33  ;;  %v214_v46 = vshrl.u32 %v409_v45, %v440_v33  ;;  %v217_v49 = vshrl.u32 %v410_v48, %v440_v33 }
 0x14b   :  { %v220_v51 = vshrl.u32 %v405_v36, %v440_v33  ;;  %vm230_vm4 = vcmp.lt.s32.totalorder %v442_v35, 3  ;;  %vm229_vm5 = vcmp.lt.s32.totalorder %v442_v35, 2  ;;  %v212_v29 = vshrl.u32 %v408_v43, %v440_v33 }
 0x14c   :  { %v224_v52 = vor.u32 %v223_v40, %v222_v37  ;;  %v227_v53 = vor.u32 %v226_v42, %v225_v39  ;;  %v215_v54 = vor.u32 %v214_v46, %v213_v44  ;;  %v218_v56 = vor.u32 %v217_v49, %v216_v47 }
 0x14d   :  { %v221_v57 = vor.u32 %v220_v51, %v219_v50 }
 0x14e   :  { %v237_v58 = vsel %vm231_vm2, %v224_v52, 920167782  ;;  %v241_v59 = vsel %vm231_vm2, %v227_v53, 1326507024  ;;  %v236_v60 = vsel %vm228_vm3, %v215_v54, %v218_v56  ;;  %v232_v37 = vsel %vm228_vm3, %v212_v29, %v215_v54 }
 0x14f   :  { %v238_v61 = vsel %vm230_vm4, %v221_v57, %v237_v58  ;;  %v240_v62 = vsel %vm228_vm3, %v218_v56, %v221_v57  ;;  %v242_v0 = vsel %vm230_vm4, %v224_v52, %v241_v59  ;;  %v233_v25 = vsel %vm231_vm2, %v221_v57, 2102212464 }
 0x150   :  { %v239_v63 = vsel %vm229_vm5, %v236_v60, %v238_v61  ;;  %v243_v2 = vsel %vm229_vm5, %v240_v62, %v242_v0  ;;  %v234_v38 = vsel %vm230_vm4, %v218_v56, %v233_v25  ;;  %vm339_vm2 = vweird.f32 %v434_v24 }
 0x151   :  { %v269_v4 = vand.u32 65535, %v239_v63  ;;  %v270_v5 = vshrl.u32 %v239_v63, 16  ;;  %v247_v6 = vand.u32 65535, %v243_v2  ;;  %v248_v7 = vshrl.u32 %v243_v2, 16 }
 0x152   :  { %v235_v33 = vsel %vm229_vm5, %v232_v37, %v234_v38 }
 0x153   :  { %v272_v8 = vmul.u32 %v270_v5, %v245_v1  ;;  %v273_v9 = vmul.u32 %v269_v4, %v246_v3  ;;  %v250_v10 = vmul.u32 %v248_v7, %v245_v1  ;;  %v251_v11 = vmul.u32 %v247_v6, %v246_v3 }
 0x154   :  { %v271_v12 = vmul.u32 %v269_v4, %v245_v1  ;;  %v249_v14 = vmul.u32 %v247_v6, %v245_v1  ;;  %v274_v16 = vmul.u32 %v270_v5, %v246_v3  ;;  %v252_v17 = vmul.u32 %v248_v7, %v246_v3 }
 0x155   :  { %v275_v13 = vshll.u32 %v272_v8, 16  ;;  %v253_v15 = vshll.u32 %v250_v10, 16  ;;  %v277_v18 = vshll.u32 %v273_v9, 16  ;;  %v255_v20 = vshll.u32 %v251_v11, 16 }
 0x156   :  { %v276_v34 = vshrl.u32 %v272_v8, 16  ;;  %v254_v39 = vshrl.u32 %v250_v10, 16  ;;  %v278_v41 = vshrl.u32 %v273_v9, 16  ;;  %v256_v44 = vshrl.u32 %v251_v11, 16 }
 0x157   :  { %vm279_vm6 = vc.u32 %v271_v12, %v275_v13  ;;  %v281_v19 = vadd.s32 %v275_v13, %v271_v12  ;;  %vm257_vm7 = vc.u32 %v249_v14, %v253_v15  ;;  %v259_v21 = vadd.s32 %v253_v15, %v249_v14 }
 0x158   :  { %v280_v23 = vsel %vm279_vm6, 1, %v411_v22  ;;  %v258_v26 = vsel %vm257_vm7, 1, %v411_v22  ;;  %v289_v49 = vmul.u32 %v449_v55, %v235_v33 }
 0x159   :  { %v282_v27 = vadd.s32 %v280_v23, %v274_v16  ;;  %vm283_vm8 = vc.u32 %v281_v19, %v277_v18  ;;  %v260_v30 = vadd.s32 %v258_v26, %v252_v17  ;;  %vm261_vm9 = vc.u32 %v259_v21, %v255_v20 }
 0x15a   :  { %v284_v31 = vsel %vm283_vm8, 1, %v411_v22  ;;  %v262_v32 = vsel %vm261_vm9, 1, %v411_v22  ;;  %v285_v47 = vadd.s32 %v281_v19, %v277_v18 }
 0x15b   :  { %v286_v36 = vadd.s32 %v284_v31, %v282_v27  ;;  %v264_v40 = vadd.s32 %v262_v32, %v260_v30 }
 0x15d   :  { %v287_v42 = vadd.s32 %v286_v36, %v276_v34  ;;  %v265_v45 = vadd.s32 %v264_v40, %v254_v39 }
 0x15f   :  { %v288_v43 = vadd.s32 %v287_v42, %v278_v41  ;;  %v266_v46 = vadd.s32 %v265_v45, %v256_v44 }
 0x161   :  { %v292_v48 = vadd.s32 1, %v288_v43  ;;  %vm291_vm10 = vc.u32 %v266_v46, %v285_v47  ;;  %v290_v61 = vadd.s32 %v285_v47, %v266_v46 }
 0x163   :  { %v293_v50 = vsel %vm291_vm10, %v292_v48, %v288_v43 }
 0x164   :  { %v294_v51 = vadd.s32 %v293_v50, %v289_v49 }
 0x166   :  { %v295_v52 = vadd.s32 536870912, %v294_v51 }
 0x168   :  { %v296_v53 = vshrl.u32 %v295_v52, 30 }
 0x16a   :  { %v297_v54 = vshll.u32 %v296_v53, 30  ;;  %v320_v15 = vsub.s32 4, %v296_v53 }
 0x16c   :  { %v298_v56 = vsub.s32 %v294_v51, %v297_v54  ;;  %v321_v20 = vsel %vm198_vm13, %v320_v15, %v296_v53 }
 0x16d   :  { %v323_v28 = vsel %vm486_vm14, 0, %v321_v20 }
 0x16e   :  { %vm299_vm11 = vcmp.lt.s32.totalorder %v298_v56, 0  ;;  %v300_v57 = vsub.s32 0, %v298_v56  ;;  %v340_v29 = vand.u32 3, %v323_v28 }
 0x170   :  { %v301_v58 = vsel %vm299_vm11, %v300_v57, %v298_v56  ;;  %vm342_vm15 = vcmp.eq.s32.totalorder %v340_v29, 0  ;;  %vm345_vm0 = vcmp.eq.s32.totalorder %v340_v29, 2  ;;  %vm341_vm1 = vcmp.lt.s32.totalorder %v340_v29, 2 }
 0x171   :  { %v302_v59 = vclz %v301_v58 }
 0x173   :  { %v368_v60 = vadd.s32 4294967294, %v302_v59 }
 0x175   :  { %vm369_vm12 = vcmp.lt.s32.totalorder %v368_v60, 0 }
 0x176   :  { %v305_v35 = vsel %vm369_vm12, 0, %v368_v60 }
 0x177   :  { %v306_v62 = vsub.s32 32, %v305_v35  ;;  %v310_v63 = vsub.s32 4294967266, %v305_v35  ;;  %v307_v0 = vshll.u32 %v298_v56, %v305_v35 }
 0x179   :  { %v308_v1 = vshrl.u32 %v290_v61, %v306_v62  ;;  %v311_v55 = vadd.s32 127, %v310_v63 }
 0x17b   :  { %v309_v2 = vor.u32 %v308_v1, %v307_v0  ;;  %v312_v3 = vshll.u32 %v311_v55, 23 }
 0x17d   :  { %v313_v4 = vor.u32 4788187, %v312_v3  ;;  %v316_v6 = vcvt.s32.f32 %v309_v2 }
 0x17f   :  { %v314_v5 = vand.u32 2147483647, %v313_v4 }
 0x181   :  { %v317_v7 = vmul.f32 %v316_v6, %v314_v5 }
 0x183   :  { %v318_v8 = vxor.u32 2147483648, %v317_v7 }
 0x185   :  { %v319_v10 = vsel %vm198_vm13, %v318_v8, %v317_v7 }
 0x186   :  { %v322_v11 = vsel %vm486_vm14, %v434_v24, %v319_v10 }
 0x187   :  { %v324_v12 = vmul.f32 %v322_v11, %v322_v11 }
 0x189   :  { %v325_v13 = vmul.f32 -0.001358992, %v324_v12  ;;  %v332_v14 = vmul.f32 -0.00019511016, %v324_v12 }
 0x18b   :  { %v326_v16 = vadd.f32 0.041655596, %v325_v13  ;;  %v333_v17 = vadd.f32 0.008332121, %v332_v14 }
 0x18d   :  { %v327_v18 = vmul.f32 %v326_v16, %v324_v12  ;;  %v334_v19 = vmul.f32 %v333_v17, %v324_v12 }
 0x18f   :  { %v328_v21 = vadd.f32 -0.4999988, %v327_v18  ;;  %v335_v22 = vadd.f32 -0.16666654, %v334_v19 }
 0x191   :  { %v329_v23 = vmul.f32 %v328_v21, %v324_v12  ;;  %v336_v25 = vmul.f32 %v335_v22, %v324_v12 }
 0x193   :  { %v330_v26 = vadd.f32 1.0, %v329_v23  ;;  %v337_v27 = vadd.f32 1.0, %v336_v25 }
 0x195   :  { %v338_v30 = vmul.f32 %v337_v27, %v322_v11  ;;  %v346_v31 = vxor.u32 2147483648, %v330_v26 }
 0x197   :  { %v343_v32 = vxor.u32 2147483648, %v338_v30  ;;  %v347_v36 = vsel %vm345_vm0, %v346_v31, %v338_v30 }
 0x199   :  { %v344_v34 = vsel %vm342_vm15, %v330_v26, %v343_v32 }
 0x19a   :  { %v348_v37 = vsel %vm341_vm1, %v344_v34, %v347_v36 }
 0x19b   :  { %v349_v38 = vsel %vm339_vm2, nan, %v348_v37 }
 0x19c   :  { %350 = vst [vmem:[#allocation2] sm:$0x3] %v349_v38 }
 0x19d   :  { %361 = dma.vmem_to_hbm [thread:$0]  %s357_s1, 32, %s359_s15, [#allocation3]  }
 0x19e   :  { %403 = dma.done.wait [#allocation3], 32  }
 0x19f   :  { %404 = vsyncadd [#allocation3], 4294967264 }
 0x1a0   :  { %366 = vsyncpa [#allocation3], 1 }

</bundles_post_ra>
